<compile_context>
chip_gen: v7x
topology: tpu7x:2x2x1
jax: 0.10.0
libtpu: 0.0.40
codegen_flags: <defaults>
</compile_context>

<pallas_src>
from functools import partial

import numpy as np
import jax
import jax.numpy as jnp
from jax import lax
from jax.experimental import pallas as pl
from jax.experimental.pallas import tpu as pltpu


def _round_up(n, m):
    return ((n + m - 1) // m) * m


# -----------------------------------------------------------------------------
# Kernel: one grid step == one forward() call (Linear+ReLU -> LSTMCell -> heads)
# -----------------------------------------------------------------------------
def _ac_net_kernel(A, H0, H1, off_ih, off_hh, off_heads,
                   invt_ref, x_ref, h0_ref, c0_ref, w_ref, b_ref,
                   out_ref, hT_ref, cT_ref, h_sc, c_sc):
    f32 = jnp.float32
    t = pl.program_id(0)

    # Load the initial recurrent state once; h_sc/c_sc persist across grid steps.
    @pl.when(t == 0)
    def _init():
        h_sc[...] = h0_ref[...]
        c_sc[...] = c0_ref[...]

    x = x_ref[0]                                    # (B_pad, input_d)
    input_d = x.shape[1]

    # ---- hidden[0]: Linear + ReLU -------------------------------------------
    # w1/b1 are zero-padded to lane_w columns, so `a` is lane-dense and
    # a[:, H0:] == 0 exactly (relu(0) = 0).
    a = jnp.maximum(
        jnp.dot(x, w_ref[0:input_d, :], preferred_element_type=f32) + b_ref[0:1, :],
        0.0)                                        # (B_pad, lane_w)

    # ---- hidden[1]: LSTMCell -------------------------------------------------
    # Two small dots instead of a lane-axis concat + fused dot:
    #   ih block keeps lane_w rows (zero rows beyond H0) so lane-dense `a` dots directly;
    #   hh block is trimmed to H1 rows (h is carried narrow, (B_pad, H1)).
    h_prev = h_sc[...]                              # (B_pad, H1)
    c_prev = c_sc[...]                              # (B_pad, H1)
    gates = (jnp.dot(a, w_ref[off_ih:off_hh, :], preferred_element_type=f32)
             + jnp.dot(h_prev, w_ref[off_hh:off_hh + H1, :],
                       preferred_element_type=f32)
             + b_ref[1:2, :])                       # (B_pad, lane_w); cols >= 4*H1 unused

    # One sigmoid + one tanh over the whole gate slab, then H1-lane slices.
    # PyTorch LSTMCell gate order: i, f, g, o.
    sig = jax.nn.sigmoid(gates)
    tnh = jnp.tanh(gates)
    i_g = sig[:, 0 * H1:1 * H1]
    f_g = sig[:, 1 * H1:2 * H1]
    g_g = tnh[:, 2 * H1:3 * H1]
    o_g = sig[:, 3 * H1:4 * H1]
    c_new = f_g * c_prev + i_g * g_g                # (B_pad, H1)
    h_new = o_g * jnp.tanh(c_new)                   # (B_pad, H1)

    # Carry state to the next grid step + expose it as an output (fixes the
    # "h/c never leave the kernel" gap; writeback to HBM happens once at the end).
    h_sc[...] = h_new
    c_sc[...] = c_new
    hT_ref[...] = h_new
    cT_ref[...] = c_new

    # ---- fused policy/value heads -> single lane-dense per-step output ------
    # comb cols [0, A): policy logits, col A: value, cols > A: exactly 0.
    comb = (jnp.dot(h_new, w_ref[off_heads:off_heads + H1, :],
                    preferred_element_type=f32) + b_ref[2:3, :])   # (B_pad, lane_w)

    inv_t = invt_ref[0, 0]                          # SMEM scalar: no recompiles per T
    col = lax.broadcasted_iota(jnp.int32, comb.shape, 1)
    is_pol = col < A
    logits = jnp.where(is_pol, comb * inv_t, -1e30)  # mask non-policy lanes
    m = jnp.max(logits, axis=1, keepdims=True)
    e = jnp.exp(logits - m)                          # masked lanes underflow to 0
    denom = jnp.sum(e, axis=1, keepdims=True)
    probs = e / denom                                # exact division (free accuracy)
    out_ref[0] = jnp.where(is_pol, probs, comb)      # one unmasked (B_pad, lane_w) store


# -----------------------------------------------------------------------------
# One-time parameter packing (hoisted out of the rollout path)
# -----------------------------------------------------------------------------
def pack_params(params, input_d, hidden_dims, action_d):
    """Transpose torch [out,in] weights to [in,out], fuse the two output heads, pre-sum the
    LSTM biases, and lay everything out in two lane-dense f32 slabs (weights DMA'd once per
    rollout and VMEM-resident across steps)."""
    H0, H1 = hidden_dims
    A = action_d
    lane_w = _round_up(max(H0, 4 * H1, A + 1, 128), 128)
    off_ih = _round_up(input_d, 8)            # Wih block: lane_w rows (zero beyond H0)
    off_hh = off_ih + lane_w                  # Whh block: H1 rows (trimmed)
    off_heads = off_hh + _round_up(H1, 8)     # fused policy/value head: H1 rows
    rows = _round_up(off_heads + _round_up(H1, 8), 8)

    w = np.zeros((rows, lane_w), np.float32)
    b = np.zeros((8, lane_w), np.float32)

    # hidden[0]: Linear(input_d -> H0)
    w[0:input_d, 0:H0] = np.asarray(params["w1"], np.float32).T
    b[0, 0:H0] = np.asarray(params["b1"], np.float32)

    # hidden[1]: LSTMCell(H0 -> H1); biases pre-summed
    w[off_ih:off_ih + H0, 0:4 * H1] = np.asarray(params["wih"], np.float32).T
    w[off_hh:off_hh + H1, 0:4 * H1] = np.asarray(params["whh"], np.float32).T
    b[1, 0:4 * H1] = (np.asarray(params["bih"], np.float32)
                      + np.asarray(params["bhh"], np.float32))

    # output heads: [Wp | Wv | 0...] -> one (H1, lane_w) weight, one bias row
    w[off_heads:off_heads + H1, 0:A] = np.asarray(params["wp"], np.float32).T
    w[off_heads:off_heads + H1, A:A + 1] = np.asarray(params["wv"], np.float32).T
    b[2, 0:A] = np.asarray(params["bp"], np.float32)
    b[2, A] = np.asarray(params["bv"], np.float32)[0]

    cfg = (A, H0, H1, input_d, lane_w, off_ih, off_hh, off_heads)
    return dict(w_slab=jnp.asarray(w), b_slab=jnp.asarray(b), cfg=cfg)


# -----------------------------------------------------------------------------
# Rollout / forward wrappers
# -----------------------------------------------------------------------------
@partial(jax.jit, static_argnames=("cfg",))
def _ac_rollout_packed(w_slab, b_slab, temperature, xs, h0, c0, cfg):
    A, H0, H1, input_d, lane_w, off_ih, off_hh, off_heads = cfg
    T, B = xs.shape[0], xs.shape[1]
    rows = w_slab.shape[0]
    B_pad = max(_round_up(B, 8), 8)                 # fill f32 sublane tile

    xs = jnp.pad(xs.astype(jnp.float32), ((0, 0), (0, B_pad - B), (0, 0)))
    h0 = jnp.pad(h0.astype(jnp.float32), ((0, B_pad - B), (0, 0)))
    c0 = jnp.pad(c0.astype(jnp.float32), ((0, B_pad - B), (0, 0)))
    inv_t = (1.0 / temperature.astype(jnp.float32)).reshape(1, 1)

    out, hT, cT = pl.pallas_call(
        partial(_ac_net_kernel, A, H0, H1, off_ih, off_hh, off_heads),
        grid=(T,),
        in_specs=[
            pl.BlockSpec(memory_space=pltpu.MemorySpace.SMEM),            # inv_t (1,1)
            pl.BlockSpec((1, B_pad, input_d), lambda t: (t, 0, 0)),       # x_t (pipelined)
            pl.BlockSpec((B_pad, H1), lambda t: (0, 0)),                  # h0 (loaded once)
            pl.BlockSpec((B_pad, H1), lambda t: (0, 0)),                  # c0 (loaded once)
            pl.BlockSpec((rows, lane_w), lambda t: (0, 0)),               # weights: resident
            pl.BlockSpec((8, lane_w), lambda t: (0, 0)),                  # biases: resident
        ],
        out_specs=(
            pl.BlockSpec((1, B_pad, lane_w), lambda t: (t, 0, 0)),        # policy|value per step
            pl.BlockSpec((B_pad, H1), lambda t: (0, 0)),                  # h_T
            pl.BlockSpec((B_pad, H1), lambda t: (0, 0)),                  # c_T
        ),
        out_shape=(
            jax.ShapeDtypeStruct((T, B_pad, lane_w), jnp.float32),
            jax.ShapeDtypeStruct((B_pad, H1), jnp.float32),
            jax.ShapeDtypeStruct((B_pad, H1), jnp.float32),
        ),
        scratch_shapes=[pltpu.VMEM((B_pad, H1), jnp.float32),             # h carry
                        pltpu.VMEM((B_pad, H1), jnp.float32)],            # c carry
        compiler_params=pltpu.CompilerParams(
            dimension_semantics=("arbitrary",)),                          # recurrent over time
    )(inv_t, xs, h0, c0, w_slab, b_slab)

    policy = out[:, :B, :A]
    value = out[:, :B, A:A + 1]
    return policy, value, hT[:B], cT[:B]


def ac_net_rollout(packed, xs, h0=None, c0=None, temperature=1.0):
    """Run T recurrent AC_Net.forward steps in one pallas_call.

    xs: [T, B, input_d]; h0/c0: [B, H1] (omit for reinit_hid semantics, i.e. zeros).
    Returns (policies [T,B,A], values [T,B,1], h_T [B,H1], c_T [B,H1])."""
    assert (h0 is None) == (c0 is None)
    cfg = packed["cfg"]
    assert xs.shape[-1] == cfg[3]
    B, H1 = xs.shape[1], cfg[2]
    if h0 is None:
        h0 = jnp.zeros((B, H1), jnp.float32)
        c0 = jnp.zeros((B, H1), jnp.float32)
    return _ac_rollout_packed(packed["w_slab"], packed["b_slab"],
                              jnp.asarray(temperature, jnp.float32),
                              jnp.asarray(xs, jnp.float32),
                              jnp.asarray(h0, jnp.float32),
                              jnp.asarray(c0, jnp.float32), cfg)


def ac_net_forward(packed, x, h0=None, c0=None, temperature=1.0):
    """Single AC_Net.forward step. Returns (policy [B,A], value [B,1], h_new, c_new)."""
    pols, vals, hT, cT = ac_net_rollout(packed, x[None], h0, c0, temperature)
    return pols[0], vals[0], hT, cT


# -----------------------------------------------------------------------------
# Init (torch-layout params) + pure-JAX reference
# -----------------------------------------------------------------------------
def init_params(key, input_d, hidden_dims, action_d):
    """Deterministic init mirroring PyTorch default uniform(-1/sqrt(fan), 1/sqrt(fan))."""
    ks = jax.random.split(key, 16)
    H0, H1 = hidden_dims

    def lin(kw, kb, in_d, out_d):
        bound = 1.0 / np.sqrt(in_d)
        w = jax.random.uniform(kw, (out_d, in_d), jnp.float32, -bound, bound)
        b = jax.random.uniform(kb, (out_d,), jnp.float32, -bound, bound)
        return w, b

    w1, b1 = lin(ks[0], ks[1], input_d, H0)
    bound = 1.0 / np.sqrt(H1)
    wih = jax.random.uniform(ks[2], (4 * H1, H0), jnp.float32, -bound, bound)
    bih = jax.random.uniform(ks[3], (4 * H1,), jnp.float32, -bound, bound)
    whh = jax.random.uniform(ks[4], (4 * H1, H1), jnp.float32, -bound, bound)
    bhh = jax.random.uniform(ks[5], (4 * H1,), jnp.float32, -bound, bound)
    wp, bp = lin(ks[6], ks[7], H1, action_d)
    wv, bv = lin(ks[8], ks[9], H1, 1)

    return dict(w1=w1, b1=b1, wih=wih, bih=bih, whh=whh, bhh=bhh,
                wp=wp, bp=bp, wv=wv, bv=bv)


def reference_step(params, x, h0, c0, temperature=1.0):
    """Plain-JAX reference of one torch forward step (for correctness checks)."""
    dot = partial(jnp.dot, precision=lax.Precision.HIGHEST)
    a = jax.nn.relu(dot(x, params["w1"].T) + params["b1"])
    H = params["whh"].shape[1]
    gates = (dot(a, params["wih"].T) + params["bih"]
             + dot(h0, params["whh"].T) + params["bhh"])
    i = jax.nn.sigmoid(gates[:, 0:H])
    f = jax.nn.sigmoid(gates[:, H:2 * H])
    g = jnp.tanh(gates[:, 2 * H:3 * H])
    o = jax.nn.sigmoid(gates[:, 3 * H:4 * H])
    c = f * c0 + i * g
    h = o * jnp.tanh(c)
    policy = jax.nn.softmax((dot(h, params["wp"].T) + params["bp"]) / temperature, axis=1)
    value = dot(h, params["wv"].T) + params["bv"]
    return policy, value, h, c


if __name__ == "__main__":
    batch_size = 4
    input_d = 32
    hidden_dims = [32, 32]          # hidden_types = ['linear', 'lstm']
    action_d = 4
    n_steps = 6

    key = jax.random.PRNGKey(0)
    kp, kx, kh, kc = jax.random.split(key, 4)
    params = init_params(kp, input_d, hidden_dims, action_d)
    packed = pack_params(params, input_d, hidden_dims, action_d)   # once, outside the loop

    xs = jax.random.normal(kx, (n_steps, batch_size, input_d), jnp.float32)

    # (1) reinit_hid() + n_steps recurrent forwards, all inside ONE pallas_call.
    pols, vals, hT, cT = ac_net_rollout(packed, xs, temperature=1.0)
    jax.block_until_ready((pols, vals, hT, cT))

    h = jnp.zeros((batch_size, hidden_dims[1]), jnp.float32)
    c = jnp.zeros_like(h)
    for t in range(n_steps):
        p_ref, v_ref, h, c = reference_step(params, xs[t], h, c, 1.0)
        np.testing.assert_allclose(np.asarray(pols[t]), np.asarray(p_ref),
                                   rtol=5e-3, atol=5e-3)
        np.testing.assert_allclose(np.asarray(vals[t]), np.asarray(v_ref),
                                   rtol=5e-3, atol=5e-3)
    np.testing.assert_allclose(np.asarray(hT), np.asarray(h), rtol=5e-3, atol=5e-3)
    np.testing.assert_allclose(np.asarray(cT), np.asarray(c), rtol=5e-3, atol=5e-3)

    # (2) single step, nonzero state, temperature != 1 (no retrace for a new T value);
    #     the returned (h, c) make the kernel chainable like the torch module's hx/cx.
    h0 = 0.5 * jax.random.normal(kh, (batch_size, hidden_dims[1]), jnp.float32)
    c0 = 0.5 * jax.random.normal(kc, (batch_size, hidden_dims[1]), jnp.float32)
    pol1, val1, h1, c1 = ac_net_forward(packed, xs[0], h0, c0, temperature=2.0)
    jax.block_until_ready((pol1, val1, h1, c1))

    p_ref, v_ref, h_ref1, c_ref1 = reference_step(params, xs[0], h0, c0, 2.0)
    np.testing.assert_allclose(np.asarray(pol1), np.asarray(p_ref), rtol=5e-3, atol=5e-3)
    np.testing.assert_allclose(np.asarray(val1), np.asarray(v_ref), rtol=5e-3, atol=5e-3)
    np.testing.assert_allclose(np.asarray(h1), np.asarray(h_ref1), rtol=5e-3, atol=5e-3)
    np.testing.assert_allclose(np.asarray(c1), np.asarray(c_ref1), rtol=5e-3, atol=5e-3)

    assert pol1.shape == (batch_size, action_d)
    assert val1.shape == (batch_size, 1)
    np.testing.assert_allclose(np.asarray(jnp.sum(pols, axis=-1)),
                               np.ones((n_steps, batch_size)), rtol=1e-4, atol=1e-4)
    print("KERNEL_OK")
</pallas_src>

<mosaic_0001>
module attributes {stable_mosaic.version = 11 : i64} {
  func.func @_ac_net_kernel(%arg0: i32, %arg1: memref<1x1xf32, #tpu.memory_space<smem>>, %arg2: memref<1x8x32xf32, #tpu.memory_space<vmem>>, %arg3: memref<8x32xf32, #tpu.memory_space<vmem>>, %arg4: memref<8x32xf32, #tpu.memory_space<vmem>>, %arg5: memref<224x128xf32, #tpu.memory_space<vmem>>, %arg6: memref<8x128xf32, #tpu.memory_space<vmem>>, %arg7: memref<1x8x128xf32, #tpu.memory_space<vmem>>, %arg8: memref<8x32xf32, #tpu.memory_space<vmem>>, %arg9: memref<8x32xf32, #tpu.memory_space<vmem>>, %arg10: memref<8x32xf32, #tpu.memory_space<vmem>>, %arg11: memref<8x32xf32, #tpu.memory_space<vmem>>) attributes {dimension_semantics = [#tpu.dimension_semantics<arbitrary>], iteration_bounds = array<i64: 6>, scalar_prefetch = 0 : i64, scratch_operands = 2 : i64, tpu.core_type = #tpu.core_type<tc>, window_params = [{transform_indices = @transform_0, window_bounds = array<i64: 1, 1>}, {transform_indices = @transform_1, window_bounds = array<i64: 1, 8, 32>}, {pipeline_mode = #tpu.pipeline_mode<synchronous>, transform_indices = @transform_2, window_bounds = array<i64: 8, 32>}, {pipeline_mode = #tpu.pipeline_mode<synchronous>, transform_indices = @transform_3, window_bounds = array<i64: 8, 32>}, {pipeline_mode = #tpu.pipeline_mode<synchronous>, transform_indices = @transform_4, window_bounds = array<i64: 224, 128>}, {pipeline_mode = #tpu.pipeline_mode<synchronous>, transform_indices = @transform_5, window_bounds = array<i64: 8, 128>}, {transform_indices = @transform_6, window_bounds = array<i64: 1, 8, 128>}, {pipeline_mode = #tpu.pipeline_mode<synchronous>, transform_indices = @transform_7, window_bounds = array<i64: 8, 32>}, {pipeline_mode = #tpu.pipeline_mode<synchronous>, transform_indices = @transform_8, window_bounds = array<i64: 8, 32>}]} {
    %c0_i32 = arith.constant 0 : i32
    %0 = arith.cmpi eq, %arg0, %c0_i32 : i32
    %1 = arith.extui %0 : i1 to i32
    %c0_i32_0 = arith.constant 0 : i32
    %2 = arith.cmpi ne, %1, %c0_i32_0 : i32
    scf.if %2 {
      %c0_37 = arith.constant 0 : index
      %c0_38 = arith.constant 0 : index
      %67 = vector.load %arg3[%c0_37, %c0_38] : memref<8x32xf32, #tpu.memory_space<vmem>>, vector<8x32xf32>
      %c0_39 = arith.constant 0 : index
      %c0_40 = arith.constant 0 : index
      %68 = vector.load %arg10[%c0_39, %c0_40] : memref<8x32xf32, #tpu.memory_space<vmem>>, vector<8x32xf32>
      tpu.vector_store %arg10[%c0_39, %c0_40], %67 {strides = array<i32>} : memref<8x32xf32, #tpu.memory_space<vmem>>, vector<8x32xf32>,
      %c0_41 = arith.constant 0 : index
      %c0_42 = arith.constant 0 : index
      %69 = vector.load %arg4[%c0_41, %c0_42] : memref<8x32xf32, #tpu.memory_space<vmem>>, vector<8x32xf32>
      %c0_43 = arith.constant 0 : index
      %c0_44 = arith.constant 0 : index
      %70 = vector.load %arg11[%c0_43, %c0_44] : memref<8x32xf32, #tpu.memory_space<vmem>>, vector<8x32xf32>
      tpu.vector_store %arg11[%c0_43, %c0_44], %69 {strides = array<i32>} : memref<8x32xf32, #tpu.memory_space<vmem>>, vector<8x32xf32>,
    } else {
    }
    %c0 = arith.constant 0 : index
    %c0_1 = arith.constant 0 : index
    %c0_2 = arith.constant 0 : index
    %3 = vector.load %arg2[%c0, %c0_1, %c0_2] : memref<1x8x32xf32, #tpu.memory_space<vmem>>, vector<1x8x32xf32>
    %4 = vector.shape_cast %3 : vector<1x8x32xf32> to vector<8x32xf32>
    %c0_3 = arith.constant 0 : index
    %c0_4 = arith.constant 0 : index
    %5 = vector.load %arg5[%c0_3, %c0_4] : memref<224x128xf32, #tpu.memory_space<vmem>>, vector<32x128xf32>
    %cst = arith.constant dense<0.000000e+00> : vector<8x128xf32>
    %6 = tpu.matmul %4, %5, %cst {dimension_numbers = #tpu.dot_dimension_numbers<[1], [0], [0], [1], [0, 0, 1, 1], [], []>} : vector<8x32xf32>, vector<32x128xf32>, vector<8x128xf32> -> vector<8x128xf32>
    %c0_5 = arith.constant 0 : index
    %c0_6 = arith.constant 0 : index
    %7 = vector.load %arg6[%c0_5, %c0_6] : memref<8x128xf32, #tpu.memory_space<vmem>>, vector<1x128xf32>
    %8 = vector.broadcast %7 : vector<1x128xf32> to vector<8x128xf32>
    %9 = arith.addf %6, %8 : vector<8x128xf32>
    %cst_7 = arith.constant 0.000000e+00 : f32
    %10 = vector.broadcast %cst_7 : f32 to vector<8x128xf32>
    %11 = arith.maximumf %9, %10 : vector<8x128xf32>
    %c0_8 = arith.constant 0 : index
    %c0_9 = arith.constant 0 : index
    %12 = vector.load %arg10[%c0_8, %c0_9] : memref<8x32xf32, #tpu.memory_space<vmem>>, vector<8x32xf32>
    %c0_10 = arith.constant 0 : index
    %c0_11 = arith.constant 0 : index
    %13 = vector.load %arg11[%c0_10, %c0_11] : memref<8x32xf32, #tpu.memory_space<vmem>>, vector<8x32xf32>
    %c32 = arith.constant 32 : index
    %c0_12 = arith.constant 0 : index
    %14 = vector.load %arg5[%c32, %c0_12] : memref<224x128xf32, #tpu.memory_space<vmem>>, vector<128x128xf32>
    %cst_13 = arith.constant dense<0.000000e+00> : vector<8x128xf32>
    %15 = tpu.matmul %11, %14, %cst_13 {dimension_numbers = #tpu.dot_dimension_numbers<[1], [0], [0], [1], [0, 0, 1, 1], [], []>} : vector<8x128xf32>, vector<128x128xf32>, vector<8x128xf32> -> vector<8x128xf32>
    %c160 = arith.constant 160 : index
    %c0_14 = arith.constant 0 : index
    %16 = vector.load %arg5[%c160, %c0_14] : memref<224x128xf32, #tpu.memory_space<vmem>>, vector<32x128xf32>
    %cst_15 = arith.constant dense<0.000000e+00> : vector<8x128xf32>
    %17 = tpu.matmul %12, %16, %cst_15 {dimension_numbers = #tpu.dot_dimension_numbers<[1], [0], [0], [1], [0, 0, 1, 1], [], []>} : vector<8x32xf32>, vector<32x128xf32>, vector<8x128xf32> -> vector<8x128xf32>
    %18 = arith.addf %15, %17 : vector<8x128xf32>
    %c1 = arith.constant 1 : index
    %c0_16 = arith.constant 0 : index
    %19 = vector.load %arg6[%c1, %c0_16] : memref<8x128xf32, #tpu.memory_space<vmem>>, vector<1x128xf32>
    %20 = vector.broadcast %19 : vector<1x128xf32> to vector<8x128xf32>
    %21 = arith.addf %18, %20 : vector<8x128xf32>
    %22 = arith.negf %21 : vector<8x128xf32>
    %23 = math.exp %22 : vector<8x128xf32>
    %cst_17 = arith.constant 1.000000e+00 : f32
    %24 = vector.broadcast %cst_17 : f32 to vector<8x128xf32>
    %25 = arith.addf %24, %23 : vector<8x128xf32>
    %26 = arith.divf %24, %25 : vector<8x128xf32>
    %27 = math.tanh %21 : vector<8x128xf32>
    %28 = vector.extract_strided_slice %26 {offsets = [0, 0], sizes = [8, 32], strides = [1, 1]} : vector<8x128xf32> to vector<8x32xf32>
    %29 = vector.extract_strided_slice %26 {offsets = [0, 32], sizes = [8, 32], strides = [1, 1]} : vector<8x128xf32> to vector<8x32xf32>
    %30 = vector.extract_strided_slice %27 {offsets = [0, 64], sizes = [8, 32], strides = [1, 1]} : vector<8x128xf32> to vector<8x32xf32>
    %31 = vector.extract_strided_slice %26 {offsets = [0, 96], sizes = [8, 32], strides = [1, 1]} : vector<8x128xf32> to vector<8x32xf32>
    %32 = arith.mulf %29, %13 : vector<8x32xf32>
    %33 = arith.mulf %28, %30 : vector<8x32xf32>
    %34 = arith.addf %32, %33 : vector<8x32xf32>
    %35 = math.tanh %34 : vector<8x32xf32>
    %36 = arith.mulf %31, %35 : vector<8x32xf32>
    %c0_18 = arith.constant 0 : index
    %c0_19 = arith.constant 0 : index
    %37 = vector.load %arg10[%c0_18, %c0_19] : memref<8x32xf32, #tpu.memory_space<vmem>>, vector<8x32xf32>
    tpu.vector_store %arg10[%c0_18, %c0_19], %36 {strides = array<i32>} : memref<8x32xf32, #tpu.memory_space<vmem>>, vector<8x32xf32>,
    %c0_20 = arith.constant 0 : index
    %c0_21 = arith.constant 0 : index
    %38 = vector.load %arg11[%c0_20, %c0_21] : memref<8x32xf32, #tpu.memory_space<vmem>>, vector<8x32xf32>
    tpu.vector_store %arg11[%c0_20, %c0_21], %34 {strides = array<i32>} : memref<8x32xf32, #tpu.memory_space<vmem>>, vector<8x32xf32>,
    %c0_22 = arith.constant 0 : index
    %c0_23 = arith.constant 0 : index
    %39 = vector.load %arg8[%c0_22, %c0_23] : memref<8x32xf32, #tpu.memory_space<vmem>>, vector<8x32xf32>
    tpu.vector_store %arg8[%c0_22, %c0_23], %36 {strides = array<i32>} : memref<8x32xf32, #tpu.memory_space<vmem>>, vector<8x32xf32>,
    %c0_24 = arith.constant 0 : index
    %c0_25 = arith.constant 0 : index
    %40 = vector.load %arg9[%c0_24, %c0_25] : memref<8x32xf32, #tpu.memory_space<vmem>>, vector<8x32xf32>
    tpu.vector_store %arg9[%c0_24, %c0_25], %34 {strides = array<i32>} : memref<8x32xf32, #tpu.memory_space<vmem>>, vector<8x32xf32>,
    %c192 = arith.constant 192 : index
    %c0_26 = arith.constant 0 : index
    %41 = vector.load %arg5[%c192, %c0_26] : memref<224x128xf32, #tpu.memory_space<vmem>>, vector<32x128xf32>
    %cst_27 = arith.constant dense<0.000000e+00> : vector<8x128xf32>
    %42 = tpu.matmul %36, %41, %cst_27 {dimension_numbers = #tpu.dot_dimension_numbers<[1], [0], [0], [1], [0, 0, 1, 1], [], []>} : vector<8x32xf32>, vector<32x128xf32>, vector<8x128xf32> -> vector<8x128xf32>
    %c2 = arith.constant 2 : index
    %c0_28 = arith.constant 0 : index
    %43 = vector.load %arg6[%c2, %c0_28] : memref<8x128xf32, #tpu.memory_space<vmem>>, vector<1x128xf32>
    %44 = vector.broadcast %43 : vector<1x128xf32> to vector<8x128xf32>
    %45 = arith.addf %42, %44 : vector<8x128xf32>
    %c0_29 = arith.constant 0 : index
    %c0_30 = arith.constant 0 : index
    %46 = memref.load %arg1[%c0_29, %c0_30] : memref<1x1xf32, #tpu.memory_space<smem>>
    %47 = tpu.iota {dimensions = array<i32: 1>} : vector<8x128xi32>
    %c4_i32 = arith.constant 4 : i32
    %48 = vector.broadcast %c4_i32 : i32 to vector<8x128xi32>
    %49 = arith.cmpi slt, %47, %48 : vector<8x128xi32>
    %50 = vector.broadcast %46 : f32 to vector<8x128xf32>
    %51 = arith.mulf %45, %50 : vector<8x128xf32>
    %cst_31 = arith.constant -1.000000e+30 : f32
    %52 = vector.broadcast %cst_31 : f32 to vector<8x128xf32>
    %53 = arith.select %49, %51, %52 : vector<8x128xi1>, vector<8x128xf32>
    %cst_32 = arith.constant dense<0xFF800000> : vector<8xf32>
    %54 = vector.multi_reduction <maximumf>, %53, %cst_32 [1] : vector<8x128xf32> to vector<8xf32>
    %55 = vector.shape_cast %54 : vector<8xf32> to vector<8x1xf32>
    %56 = vector.broadcast %55 : vector<8x1xf32> to vector<8x128xf32>
    %57 = arith.subf %53, %56 : vector<8x128xf32>
    %58 = math.exp %57 : vector<8x128xf32>
    %cst_33 = arith.constant dense<0.000000e+00> : vector<8xf32>
    %59 = vector.multi_reduction <add>, %58, %cst_33 [1] : vector<8x128xf32> to vector<8xf32>
    %60 = vector.shape_cast %59 : vector<8xf32> to vector<8x1xf32>
    %61 = vector.broadcast %60 : vector<8x1xf32> to vector<8x128xf32>
    %62 = arith.divf %58, %61 : vector<8x128xf32>
    %63 = arith.select %49, %62, %45 : vector<8x128xi1>, vector<8x128xf32>
    %c0_34 = arith.constant 0 : index
    %c0_35 = arith.constant 0 : index
    %c0_36 = arith.constant 0 : index
    %64 = vector.load %arg7[%c0_34, %c0_35, %c0_36] : memref<1x8x128xf32, #tpu.memory_space<vmem>>, vector<1x8x128xf32>
    %65 = vector.shape_cast %64 : vector<1x8x128xf32> to vector<8x128xf32>
    %66 = vector.shape_cast %63 : vector<8x128xf32> to vector<1x8x128xf32>
    tpu.vector_store %arg7[%c0_34, %c0_35, %c0_36], %66 {strides = array<i32>} : memref<1x8x128xf32, #tpu.memory_space<vmem>>, vector<1x8x128xf32>,
    return
  }
  func.func @transform_0(%arg0: i32) -> (i32, i32) {
    %c0_i32 = arith.constant 0 : i32
    %c0_i32_0 = arith.constant 0 : i32
    %c0_i32_1 = arith.constant 0 : i32
    return %c0_i32, %c0_i32_0 : i32, i32
  }
  func.func @transform_1(%arg0: i32) -> (i32, i32, i32) {
    %c0_i32 = arith.constant 0 : i32
    %c0_i32_0 = arith.constant 0 : i32
    %c0_i32_1 = arith.constant 0 : i32
    return %arg0, %c0_i32, %c0_i32_0 : i32, i32, i32
  }
  func.func @transform_2(%arg0: i32) -> (i32, i32) {
    %c0_i32 = arith.constant 0 : i32
    %c0_i32_0 = arith.constant 0 : i32
    %c0_i32_1 = arith.constant 0 : i32
    return %c0_i32, %c0_i32_0 : i32, i32
  }
  func.func @transform_3(%arg0: i32) -> (i32, i32) {
    %c0_i32 = arith.constant 0 : i32
    %c0_i32_0 = arith.constant 0 : i32
    %c0_i32_1 = arith.constant 0 : i32
    return %c0_i32, %c0_i32_0 : i32, i32
  }
  func.func @transform_4(%arg0: i32) -> (i32, i32) {
    %c0_i32 = arith.constant 0 : i32
    %c0_i32_0 = arith.constant 0 : i32
    %c0_i32_1 = arith.constant 0 : i32
    return %c0_i32, %c0_i32_0 : i32, i32
  }
  func.func @transform_5(%arg0: i32) -> (i32, i32) {
    %c0_i32 = arith.constant 0 : i32
    %c0_i32_0 = arith.constant 0 : i32
    %c0_i32_1 = arith.constant 0 : i32
    return %c0_i32, %c0_i32_0 : i32, i32
  }
  func.func @transform_6(%arg0: i32) -> (i32, i32, i32) {
    %c0_i32 = arith.constant 0 : i32
    %c0_i32_0 = arith.constant 0 : i32
    %c0_i32_1 = arith.constant 0 : i32
    return %arg0, %c0_i32, %c0_i32_0 : i32, i32, i32
  }
  func.func @transform_7(%arg0: i32) -> (i32, i32) {
    %c0_i32 = arith.constant 0 : i32
    %c0_i32_0 = arith.constant 0 : i32
    %c0_i32_1 = arith.constant 0 : i32
    return %c0_i32, %c0_i32_0 : i32, i32
  }
  func.func @transform_8(%arg0: i32) -> (i32, i32) {
    %c0_i32 = arith.constant 0 : i32
    %c0_i32_0 = arith.constant 0 : i32
    %c0_i32_1 = arith.constant 0 : i32
    return %c0_i32, %c0_i32_0 : i32, i32
  }
}

</mosaic_0001>

<bundles_post_ra>
// kernel: _ac_rollout_packed.1
= control target key start
LH: loop header
LB: loop body
LE: loop exit
PB: predicated region body
PF: predicated region fallthrough
CT: control target
= control target key end

     0   :  { %s1207_s0 = inlined_call_operand.<no memory space> [shape: f32[1,1], index: 0, kind: input, shape index: {}]   ;;  %s1208_s1 = inlined_call_operand.vmem [shape: f32[6,8,32], index: 1, kind: input, shape index: {}]   ;;  %s1209_s2 = inlined_call_operand.vmem [shape: f32[8,32], index: 2, kind: input, shape index: {}]   ;;  %s1210_s3 = inlined_call_operand.vmem [shape: f32[8,32], index: 3, kind: input, shape index: {}]   ;;  %s1211_s4 = inlined_call_operand.hbm [shape: f32[224,128], index: 4, kind: input, shape index: {}]   ;;  %s1212_s5 = inlined_call_operand.vmem [shape: f32[8,128], index: 5, kind: input, shape index: {}]   ;;  %s1213_s6 = inlined_call_operand.vmem [shape: f32[6,8,128], index: 6, kind: output, shape index: {0}]   ;;  %s1214_s7 = inlined_call_operand.vmem [shape: f32[8,32], index: 7, kind: output, shape index: {1}]   ;;  %s1215_s8 = inlined_call_operand.vmem [shape: f32[8,32], index: 8, kind: output, shape index: {2}]  }
   0x1   :  { %14 = sst [smem:[#allocation4]] %s1207_s0 }
   0x2   :  { %15 = vsyncpa [#allocation6], 0  ;;  %s1090_s29 = smov 0  }
   0x3 LB: > { %s1096_s30 = sadd.s32 4294967295, %s1031_s29   ;;  %p795_p0 = scmp.ge.s32.totalorder %s1031_s29, 1  ;;  %s1031_s29 = sphi %s1090_s29, %s21_s29  }
   0x4   : > { %p225_p1 = scmp.lt.s32.totalorder %s1031_s29, 7  ;;  %s1033_s0 = smov [#allocation5]  }
   0x5   : > { %s246_s9 = sshll.u32 %s1033_s0, 4  ;;  %p1216_p4 = scmp.eq.s32.totalorder %s1096_s30, 0  ;;  %s247_s9 = int_to_ptr.vmem [resolvable:$true] %s246_s9 }
   0x6   : > { %p1101_p3 = pnand %p795_p0, %p225_p1  ;;  %s993_s14 = scalar_lea.hbm %s1211_s4, 3584 }
   0x7   : > { %p994_p7 = scmp.ne.s32.totalorder %s1211_s4, %s993_s14  ;;  %p1000_p11 = scmp.lt.u32.totalorder %s993_s14, %s1211_s4 }
   0x8   : > { %s1218_s10 = scalar_select %p1101_p3, 1, 0 }
   0x9   : > { %p958_p5 = pneg %p1101_p3 }
   0xb   : > { %p1110_p6 = pnand %p1216_p4, %p958_p5 }
   0xd   : > { %p995_p8 = pneg %p1110_p6 }
   0xf   : > { %p996_p9 = pnand %p995_p8, %p994_p7 }
  0x11   : > { %p997_p10 = pneg %p996_p9 }
  0x13   : > { %p1002_p12 = pnand %p1000_p11, %p997_p10 }
  0x15   : > { %1005 = shalt.err (!%p1002_p12)
}
  0x16   : > { %s1006_s19 = scalar_lea.vmem %s247_s9, 3584  ;;  %p1014_p5 = scmp.lt.s32.totalorder %s247_s9, %s247_s9 }
  0x17   : > { %p1007_p13 = scmp.ne.s32.totalorder %s247_s9, %s1006_s19  ;;  %p1015_p2 = scmp.lt.s32.totalorder %s1006_s19, %s1006_s19 }
  0x19   : > { %p1009_p0 = pnand %p1007_p13, %p995_p8  ;;  %p1016_p4 = por %p1015_p2, %p1014_p5 }
  0x1b   : > { %p1010_p1 = pneg %p1009_p0 }
  0x1d   : > { %p1017_p3 = pnand %p1016_p4, %p1010_p1 }
  0x1f   : > { %1020 = shalt.err (!%p1017_p3)
}
  0x20   : > { %s1034_s20 = smov 128   ;;  %s1035_s21 = smov 8  }
  0x21   : > { %961 = dma.hbm_to_vmem [thread:$0]  (!%p1110_p6), %s1211_s4, 3584, %s247_s9, [#allocation6], %s1034_s20, %s1034_s20, %s1035_s21  }
  0x22   : > { %p1220_p7 = scmp.ne.s32.totalorder %s1218_s10, 0 }
  0x23   : > { %p1221_p9 = scmp.eq.s32.totalorder (!%p1220_p7), %s1096_s30, 0 }
  0x24   : > { %272 = sbr.rel (%p1220_p7) target bundleno = 1515 (0x5eb), region = 44 }
  0x2b   : > { %1026 = dma.done.wait (%p1221_p9), [#allocation6], 3584   ;;  %p1222_p8 = pmov %p1221_p9 }
  0x2c   : > { %p304_p2 = scmp.lt.s32.totalorder %s1096_s30, 5  ;;  %p1223_p3 = scmp.ne.s32.totalorder %s1096_s30, 0 }
  0x2d   : > { %1028 = vsyncadd (%p1222_p8), [#allocation6], 4294963712  ;;  %v316_v0 = vld [vmem:[%s1209_s2] sm:$0xff] (!%p1223_p3)  ;;  %vm317_vm0 = vcmask (!%p1223_p3), 261120  }
  0x2e   : > { %s305_s24 = scalar_select %p304_p2, %s1096_s30, 5 }
  0x2f   : > { %315 = sbr.rel (%p1223_p3) target bundleno = 54 (0x36), region = 52  ;;  %v319_v1 = vld [vmem:[%s1210_s3] sm:$0xff] (!%p1223_p3)  ;;  %318 = vst.msk [vmem:[#allocation2] sm:$0xff] (!%p1223_p3), %vm317_vm0, %v316_v0 }
  0x30   : > { %s800_s25 = sshll.u32 %s305_s24, 3  ;;  %320 = vst.msk [vmem:[#allocation3] sm:$0xff] (!%p1223_p3), %vm317_vm0, %v319_v1 }
  0x31   : > { %s1141_s28 = scalar_lea.vmem %s1208_s1, %s800_s25  ;;  %s1146_s10 = scalar_lea.vmem %s1213_s6, %s800_s25 }
  0x36 PF: > { %v322_v2 = vld [vmem:[#allocation5] sm:$0xff]  ;;  %v323_v3 = vld [vmem:[#allocation5 + $0x8] sm:$0xff]  ;;  %v324_v4 = vld [vmem:[#allocation5 + $0x10] sm:$0xff]  ;;  %v1036_v5 = vmov 0.0|0.0   ;;  %vm1037_vm1 = vmmov 0   ;;  %v1038_v8 = vmov 0.0  }
  0x37   : > { %912 = vmatprep.subr.bf16.mxu1 %v1036_v5  ;;  %v913_v6 = vpack.c.bf16 %v323_v3, %v322_v2  ;;  %v325_v7 = vld [vmem:[#allocation5 + $0x18] sm:$0xff]  ;;  %852 = vmatprep.mubr.msk.f32.mxu1 %vm1037_vm1, %v1038_v8  ;;  %v408_v9 = vld [vmem:[#allocation5 + $0x20] sm:$0xff]  ;;  %v409_v10 = vld [vmem:[#allocation5 + $0x28] sm:$0xff]  ;;  %vm331_vm2 = vcmask 261120   ;;  %s1039_s18 = smov 64   ;;  %s1040_s19 = smov 32  }
  0x38   : > { %924 = vmatprep.subr.bf16.mxu0 %v1036_v5  ;;  %v410_v11 = vld [vmem:[#allocation5 + $0x30] sm:$0xff]  ;;  %v411_v12 = vld [vmem:[#allocation5 + $0x38] sm:$0xff]  ;;  %898 = vmatprep.mubr.msk.f32.mxu0 %vm1037_vm1, %v1038_v8  ;;  %v916_v13 = vpack.c.bf16 %v325_v7, %v324_v4  ;;  %v925_v14 = vpack.c.bf16 %v409_v10, %v408_v9  ;;  %v424_v16 = vld [vmem:[#allocation5 + $0xa0] sm:$0xff]  ;;  %s698_s22 = sld [smem:[#allocation4]]  ;;  %s1041_s25 = smov 96  }
  0x39   : > { %914 = vmatpush3.bf16.msra.mxu1 %v913_v6  ;;  %v928_v15 = vpack.c.bf16 %v411_v12, %v410_v11  ;;  %v412_v17 = vld [vmem:[#allocation5 + $0x40] sm:$0xff]  ;;  %v413_v18 = vld [vmem:[#allocation5 + $0x48] sm:$0xff]  ;;  %v321_v20 = vld [vmem:[%s1141_s28] sm:$0xff] }
  0x3a   : > { %915 = vmatprep.subr.bf16.mxu1 %v1036_v5  ;;  %926 = vmatpush3.bf16.msra.mxu0 %v925_v14  ;;  %v425_v19 = vld [vmem:[#allocation5 + $0xa8] sm:$0xff]  ;;  %v931_v22 = vpack.c.bf16 %v413_v18, %v412_v17  ;;  %v414_v23 = vld [vmem:[#allocation5 + $0x50] sm:$0xff]  ;;  %v415_v24 = vld [vmem:[#allocation5 + $0x58] sm:$0xff] }
  0x3b   : > { %927 = vmatprep.subr.bf16.mxu0 %v1036_v5  ;;  %v919_v21 = vpack.c.bf16 %v425_v19, %v424_v16  ;;  %v934_v25 = vpack.c.bf16 %v415_v24, %v414_v23  ;;  %v416_v26 = vld [vmem:[#allocation5 + $0x60] sm:$0xff]  ;;  %v417_v27 = vld [vmem:[#allocation5 + $0x68] sm:$0xff]  ;;  %v418_v29 = vld [vmem:[#allocation5 + $0x70] sm:$0xff] }
  0x3c   : > { %v937_v28 = vpack.c.bf16 %v417_v27, %v416_v26  ;;  %v419_v30 = vld [vmem:[#allocation5 + $0x78] sm:$0xff]  ;;  %v420_v32 = vld [vmem:[#allocation5 + $0x80] sm:$0xff]  ;;  %v421_v33 = vld [vmem:[#allocation5 + $0x88] sm:$0xff] }
  0x3d   : > { %917 = vmatpush3.bf16.msra.mxu1 %v916_v13  ;;  %v940_v31 = vpack.c.bf16 %v419_v30, %v418_v29  ;;  %v943_v34 = vpack.c.bf16 %v421_v33, %v420_v32  ;;  %v426_v35 = vld [vmem:[#allocation5 + $0xb0] sm:$0xff]  ;;  %v427_v36 = vld [vmem:[#allocation5 + $0xb8] sm:$0xff]  ;;  %v617_v2 = vld [vmem:[#allocation5 + $0xc0] sm:$0xff]  ;;  %v699_v13 = vlaneseq }
  0x3e   : > { %918 = vmatprep.subr.bf16.mxu1 %v1036_v5  ;;  %929 = vmatpush3.bf16.msra.mxu0 %v928_v15  ;;  %v922_v37 = vpack.c.bf16 %v427_v36, %v426_v35  ;;  %v422_v38 = vld [vmem:[#allocation5 + $0x90] sm:$0xff]  ;;  %v423_v39 = vld [vmem:[#allocation5 + $0x98] sm:$0xff]  ;;  %v618_v3 = vld [vmem:[#allocation5 + $0xc8] sm:$0xff]  ;;  %v702_v16 = vstv %s698_s22 }
  0x3f   : > { %930 = vmatprep.subr.bf16.mxu0 %v1036_v5  ;;  %v946_v40 = vpack.c.bf16 %v423_v39, %v422_v38  ;;  %v406_v41 = vld [vmem:[#allocation2] sm:$0xff]  ;;  %v407_v55 = vld [vmem:[#allocation3] sm:$0xff]  ;;  %v949_v6 = vpack.c.bf16 %v618_v3, %v617_v2  ;;  %v700_v14 = vand.u32 127, %v699_v13 }
  0x40   : > { %853 = vmatmul.mubr.msk.f32.vlgmr.msra.gmra.mrb[0].mxu1 %vm331_vm2, %v321_v20  ;;  %v803_v42 = vld [vmem:[%s1212_s5] ss:$0 sm:$0xff]  ;;  %v806_v50 = vld [vmem:[%s1212_s5 + $0x1] ss:$0 sm:$0xff]  ;;  %v620_v7 = vld [vmem:[#allocation5 + $0xd8] sm:$0xff] }
  0x41   : > { %920 = vmatpush3.bf16.msra.mxu1 %v919_v21  ;;  %863 = vmatprep.mubr.msk.f32.mxu1 %vm1037_vm1, %v1038_v8  ;;  %v619_v4 = vld [vmem:[#allocation5 + $0xd0] sm:$0xff]  ;;  %vm701_vm3 = vcmp.lt.s32.totalorder %v700_v14, 4 }
  0x42   : > { %921 = vmatprep.subr.bf16.mxu1 %v1036_v5  ;;  %932 = vmatpush3.bf16.msra.mxu0 %v931_v22 }
  0x43   : > { %933 = vmatprep.subr.bf16.mxu0 %v1036_v5 }
  0x45   : > { %923 = vmatpush3.bf16.msra.mxu1 %v922_v37 }
  0x46   : > { %935 = vmatpush3.bf16.msra.mxu0 %v934_v25  ;;  %948 = vmatprep.subr.bf16.mxu1 %v1036_v5 }
  0x47   : > { %936 = vmatprep.subr.bf16.mxu0 %v1036_v5 }
  0x48   : > { %864 = vmatmul.mubr.msk.f32.vlgmr.msra.gmra.mrb[2].mxu1 %vm331_vm2, %v406_v41 }
  0x49   : > { %909 = vmatprep.mubr.msk.f32.mxu1 %vm1037_vm1, %v1038_v8  ;;  %950 = vmatpush3.bf16.msra.mxu1 %v949_v6  ;;  %v952_v8 = vpack.c.bf16 %v620_v7, %v619_v4 }
  0x4a   : > { %938 = vmatpush3.bf16.msra.mxu0 %v937_v28  ;;  %951 = vmatprep.subr.bf16.mxu1 %v1036_v5 }
  0x4b   : > { %939 = vmatprep.subr.bf16.mxu0 %v1036_v5 }
  0x4d   : > { %953 = vmatpush3.bf16.msra.mxu1 %v952_v8 }
  0x4e   : > { %941 = vmatpush3.bf16.msra.mxu0 %v940_v31 }
  0x4f   : > { %942 = vmatprep.subr.bf16.mxu0 %v1036_v5 }
  0x52   : > { %944 = vmatpush3.bf16.msra.mxu0 %v943_v34 }
  0x53   : > { %945 = vmatprep.subr.bf16.mxu0 %v1036_v5  ;;  %v808_v5 = vld [vmem:[%s1212_s5 + $0x2] ss:$0 sm:$0xff] }
  0x56   : > { %947 = vmatpush3.bf16.msra.mxu0 %v946_v40 }
 0x113   : > { %v401_v43 = vpop.f32.mrb[0].mxu1 }
 0x114   : > { %v402_v44 = vadd.f32 %v803_v42, %v401_v43  ;;  %v854_v45 = vpop.f32.mrb[1].mxu1 }
 0x116   : > { %v405_v46 = vmax.f32 %v402_v44, 0.0 }
 0x118   : > { %899 = vmatmul.mubr.f32.vlgmr.msra.gmra.mrb[0].mxu0 %v405_v46 }
 0x11b   : > { %v497_v47 = vpop.f32.mrb[2].mxu1 }
 0x11c   : > { %v865_v48 = vpop.f32.mrb[3].mxu1 }
 0x1eb   : > { %v567_v49 = vpop.f32.mrb[0].mxu0 }
 0x1ec   : > { %v568_v51 = vadd.f32 %v567_v49, %v497_v47  ;;  %v900_v52 = vpop.f32.mrb[1].mxu0 }
 0x1ee   : > { %v576_v53 = vadd.f32 %v806_v50, %v568_v51 }
 0x1f0   : > { %981 = vtanh.f32 %v576_v53  ;;  %v807_v56 = vmul.f32 -1.442695, %v576_v53 }
 0x1f2   : > { %983 = vpow2.f32 %v807_v56 }
 0x1fa   : > { %v982_v54 = vpop.eup %981 }
 0x1fb   : > { %590 = vrot.lane.b32.xlu0 %v982_v54, %s1039_s18 }
 0x1fc   : > { %v984_v57 = vpop.eup %983 }
 0x1fd   : > { %v580_v58 = vadd.f32 1.0, %v984_v57 }
 0x1ff   : > { %585 = vrot.lane.b32.xlu0 %v407_v55, %s1040_s19  ;;  %985 = vrcp.f32 %v580_v58 }
 0x209   : > { %v986_v59 = vpop.eup %985 }
 0x26d   : > { %v591_v60 = vpop.permute.xlu0 %590 }
 0x26e   : > { %v593_v61 = vmul.f32 %v986_v59, %v591_v60 }
 0x270   : > { %595 = vrot.lane.b32.xlu1 %v593_v61, %s1040_s19 }
 0x271   : > { %v586_v62 = vpop.permute.xlu0 %585 }
 0x272   : > { %v588_v63 = vmul.f32 %v986_v59, %v586_v62 }
 0x2e2   : > { %v596_v0 = vpop.permute.xlu1 %595 }
 0x2e3   : > { %v598_v1 = vadd.f32 %v596_v0, %v588_v63 }
 0x2e5   : > { %987 = vtanh.f32 %v598_v1 }
 0x2ef   : > { %v988_v9 = vpop.eup %987 }
 0x2f0   : > { %601 = vrot.lane.b32.xlu1 %v988_v9, %s1039_s18 }
 0x362   : > { %v602_v10 = vpop.permute.xlu1 %601 }
 0x363   : > { %v604_v11 = vmul.f32 %v986_v59, %v602_v10 }
 0x365   : > { %606 = vrot.lane.b32.xlu0 %v604_v11, %s1040_s19 }
 0x3d7   : > { %v607_v12 = vpop.permute.xlu0 %606 }
 0x3d8   : > { %609 = vst.msk [vmem:[#allocation2] sm:$0xff] %vm331_vm2, %v607_v12  ;;  %615 = vst.msk [vmem:[%s1214_s7] sm:$0xff] %vm331_vm2, %v607_v12  ;;  %910 = vmatmul.mubr.msk.f32.vlgmr.msra.gmra.mrb[4].mxu1 %vm331_vm2, %v607_v12 }
 0x4ab   : > { %v694_v15 = vpop.f32.mrb[4].mxu1 }
 0x4ac   : > { %v695_v17 = vadd.f32 %v808_v5, %v694_v15  ;;  %v911_v18 = vpop.f32.mrb[5].mxu1 }
 0x4ae   : > { %v703_v19 = vmul.f32 %v702_v16, %v695_v17 }
 0x4b0   : > { %v704_v20 = vsel %vm701_vm3, %v703_v19, -1e+30 }
 0x4b1   : > { %705 = vmax.xlane.f32.xlu1 %v704_v20 }
 0x53e   : > { %v706_v21 = vpop.xlane.xlu1 %705 }
 0x53f   : > { %v707_v22 = vsub.f32 %v704_v20, %v706_v21 }
 0x541   : > { %v708_v23 = vmul.f32 1.442695, %v707_v22 }
 0x543   : > { %989 = vpow2.f32 %v708_v23 }
 0x54d   : > { %v990_v24 = vpop.eup %989 }
 0x54e   : > { %710 = vadd.xlane.f32.xlu0 %v990_v24 }
 0x564   : > { %611 = vrot.lane.b32.xlu0 %v598_v1, %s1041_s25 }
 0x5db   : > { %v711_v25 = vpop.xlane.xlu0 %710 }
 0x5dc   : > { %991 = vrcp.f32 %v711_v25 }
 0x5df   : > { %v612_v26 = vpop.permute.xlu0 %611 }
 0x5e0   : > { %614 = vst.msk [vmem:[#allocation3] sm:$0xff] %vm331_vm2, %v612_v26  ;;  %616 = vst.msk [vmem:[%s1215_s8] sm:$0xff] %vm331_vm2, %v612_v26 }
 0x5e6   : > { %v992_v27 = vpop.eup %991 }
 0x5e7   : > { %v713_v28 = vmul.f32 %v992_v27, %v990_v24 }
 0x5e9   : > { %v714_v29 = vsel %vm701_vm3, %v713_v28, %v695_v17 }
 0x5ea   : > { %715 = vst [vmem:[%s1146_s10] sm:$0xff] %v714_v29 }
 0x5eb PF: > { %s21_s29 = sadd.s32 1, %s1031_s29  }
 0x5ec   : > { %p18_p4 = scmp.ge.s32.totalorder %s21_s29, 8  }
 0x5ee   :  { %20 = sbr.rel (!%p18_p4) target bundleno = 3 (0x3), region = 99 }
 0x5f5   :  { %747 = vsyncpa [#allocation6], 1 }
 0x5f6   :  { %749 = vsyncpa [#allocation6 + $0x1], 1 }

</bundles_post_ra>
